<compile_context>
chip_gen: v5e
topology: v5e:2x2
jax: 0.10.0
libtpu: 0.0.40
codegen_flags: <defaults>
</compile_context>

<pallas_src>
import functools
import math

import jax
import jax.numpy as jnp
from jax import lax
from jax.experimental import pallas as pl
from jax.experimental.pallas import tpu as pltpu


# ---------------------------------------------------------------------------
# Parameter setup (glue): positional-encoding table, shape (seq_len, 1, D)
# ---------------------------------------------------------------------------
def make_positional_encoding(seq_len: int, d_model: int,
                             dtype=jnp.float32) -> jnp.ndarray:
    position = jnp.arange(seq_len, dtype=jnp.float32)[:, None]            # (S, 1)
    div_term = jnp.exp(
        jnp.arange(0, d_model, 2, dtype=jnp.float32) * (-math.log(10000.0) / d_model)
    )                                                                      # (D/2,)
    angles = position * div_term                                           # (S, D/2)
    pe = jnp.zeros((seq_len, d_model), dtype=jnp.float32)
    pe = pe.at[:, 0::2].set(jnp.sin(angles))
    pe = pe.at[:, 1::2].set(jnp.cos(angles))
    return pe.astype(dtype)[:, None, :]                                    # (S, 1, D)


# ---------------------------------------------------------------------------
# In-kernel counter-based PRNG helpers (pure jnp/lax -> runs on TPU + interpret)
# ---------------------------------------------------------------------------
_GOLDEN = 0x9E3779B9   # odd 32-bit constant for seed mixing
_M1 = 0x85EBCA6B       # murmur3 fmix32 constants
_M2 = 0xC2B2AE35


def _fmix32(h):
    """murmur3 finalizer: maps uint32 -> well-mixed uniform uint32."""
    h = h ^ (h >> 16)
    h = h * jnp.uint32(_M1)
    h = h ^ (h >> 13)
    h = h * jnp.uint32(_M2)
    h = h ^ (h >> 16)
    return h


# ---------------------------------------------------------------------------
# Pallas kernel: out = dropout(x + pe)
# ---------------------------------------------------------------------------
def _pe_add_dropout_kernel(seed_ref, x_ref, pe_ref, o_ref, *, p, training, seq_len):
    # x_ref / o_ref: (B, ts, D) VMEM tiles;  pe_ref: (ts, D) broadcast over batch.
    y = x_ref[...] + pe_ref[...]

    if training and p > 0.0:
        B, ts, D = x_ref.shape
        # Global element index (tiling-invariant) hashed with the seed.
        b_io = lax.broadcasted_iota(jnp.int32, (B, ts, D), 0)
        s_io = lax.broadcasted_iota(jnp.int32, (B, ts, D), 1)
        d_io = lax.broadcasted_iota(jnp.int32, (B, ts, D), 2)
        s_glob = s_io + pl.program_id(0) * ts
        flat = (b_io * seq_len + s_glob) * D + d_io          # wraps mod 2^32: fine
        h = lax.bitcast_convert_type(flat, jnp.uint32)
        seed_u = lax.bitcast_convert_type(seed_ref[0], jnp.uint32)
        h = h ^ (seed_u * jnp.uint32(_GOLDEN))               # decorrelate seeds
        h = _fmix32(h)
        # Integer-threshold compare (no f32 uniform temporaries); fold 1/(1-p).
        thresh = jnp.uint32(min(0xFFFFFFFF, int(p * 4294967296.0)))
        keep = h >= thresh                                   # P(keep) = 1 - p
        inv_keep = jnp.asarray(1.0 / (1.0 - p), dtype=y.dtype)
        y = jnp.where(keep, y * inv_keep, jnp.zeros_like(y))

    o_ref[...] = y.astype(o_ref.dtype)


# ---------------------------------------------------------------------------
# Tile selection: largest 8-aligned divisor of S fitting the VMEM budget
# ---------------------------------------------------------------------------
def _choose_seq_tile(S, B, D, itemsize, budget_bytes=16 * 1024 * 1024):
    def working_set(ts):
        # double-buffered x-in + out + pe tiles
        return 2 * (2 * B * ts * D + ts * D) * itemsize

    if working_set(S) <= budget_bytes:
        return S
    ts = (S // 8) * 8
    while ts >= 8:
        if S % ts == 0 and working_set(ts) <= budget_bytes:
            return ts
        ts -= 8
    # TODO(synk): cdiv grid with masked ragged tail (and batch tiling) for
    # shapes with no 8-aligned seq divisor that fits the budget.
    return S if S % 8 else 8


# ---------------------------------------------------------------------------
# Wrapper
# ---------------------------------------------------------------------------
def positional_encoding_forward(x, pe, seed, *, p=0.1, training=False,
                                ts=None, vmem_budget_bytes=16 * 1024 * 1024):
    """x: (S, B, D) seq-first (module layout).  pe: (seq_len, 1, D) or (seq_len, D)."""
    S, B, D = x.shape
    pe2d = pe.reshape(pe.shape[0], D)[:S].astype(x.dtype)     # self.pe[:x.size(0)]

    # Batch-first so each block's last two dims are (ts_seq, D): lane-dense
    # (D multiple of 128) and sublane-dense (ts_seq multiple of 8) even for
    # small batch.  Callers already holding (B, S, D) can skip these transposes.
    x_bf = jnp.transpose(x, (1, 0, 2))                        # (B, S, D)

    if ts is None:
        ts = _choose_seq_tile(S, B, D, x.dtype.itemsize, vmem_budget_bytes)
    assert S % ts == 0 and (ts % 8 == 0 or ts == S), (S, ts)
    grid = (S // ts,)

    kernel = functools.partial(_pe_add_dropout_kernel, p=float(p),
                               training=bool(training), seq_len=S)

    out_bf = pl.pallas_call(
        kernel,
        out_shape=jax.ShapeDtypeStruct((B, S, D), x.dtype),
        grid_spec=pltpu.PrefetchScalarGridSpec(
            num_scalar_prefetch=1,                            # seed -> SMEM
            grid=grid,
            in_specs=[
                pl.BlockSpec((B, ts, D), lambda i, seed_ref: (0, i, 0)),
                pl.BlockSpec((ts, D), lambda i, seed_ref: (i, 0)),
            ],
            out_specs=pl.BlockSpec((B, ts, D), lambda i, seed_ref: (0, i, 0)),
        ),
        compiler_params=pltpu.CompilerParams(
            dimension_semantics=("parallel",),                # steps independent (v7x 2 TCs)
            vmem_limit_bytes=48 * 1024 * 1024,                # safe on v7x's 64 MiB VMEM
        ),
    )(seed, x_bf, pe2d)

    return jnp.transpose(out_bf, (1, 0, 2))                   # back to (S, B, D)


# ---------------------------------------------------------------------------
# Demo / correctness check
# ---------------------------------------------------------------------------
if __name__ == "__main__":
    d_model = 128    # lane-dense hidden size (multiple of 128)
    seq_len = 16     # pe table length (module's seq_len)
    S = 8            # x.size(0) <= seq_len
    B = 2
    p_drop = 0.1

    key = jax.random.PRNGKey(0)
    x = jax.random.normal(key, (S, B, d_model), dtype=jnp.float32)
    pe = make_positional_encoding(seq_len, d_model)
    seed = jnp.array([0], dtype=jnp.int32)

    ref = x + pe[:S]

    # Eval mode: dropout is identity -> exact check.
    out_eval = jax.block_until_ready(
        positional_encoding_forward(x, pe, seed, p=p_drop, training=False))
    assert out_eval.shape == (S, B, d_model)
    assert jnp.allclose(out_eval, ref, atol=1e-6, rtol=1e-6)

    # Training mode: survivors == (x + pe)/(1-p), dropped == 0, drop-rate ~ p.
    out_train = jax.block_until_ready(
        positional_encoding_forward(x, pe, seed, p=p_drop, training=True))
    scaled_ref = ref / (1.0 - p_drop)
    dropped = out_train == 0
    kept_err = jnp.where(dropped, 0.0, jnp.abs(out_train - scaled_ref))
    assert bool(jnp.all(kept_err < 1e-5))
    drop_rate = float(jnp.mean(dropped.astype(jnp.float32)))
    assert 0.01 < drop_rate < 0.35, drop_rate

    print("KERNEL_OK")
</pallas_src>

<mosaic_0001>
module attributes {stable_mosaic.version = 11 : i64} {
  func.func @_pe_add_dropout_kernel(%arg0: i32, %arg1: memref<1xi32, #tpu.memory_space<smem>>, %arg2: memref<2x8x128xf32, #tpu.memory_space<vmem>>, %arg3: memref<8x128xf32, #tpu.memory_space<vmem>>, %arg4: memref<2x8x128xf32, #tpu.memory_space<vmem>>) attributes {dimension_semantics = [#tpu.dimension_semantics<parallel>], iteration_bounds = array<i64: 1>, scalar_prefetch = 1 : i64, scratch_operands = 0 : i64, tpu.core_type = #tpu.core_type<tc>, window_params = [{transform_indices = @transform_0, window_bounds = array<i64: 2, 8, 128>}, {transform_indices = @transform_1, window_bounds = array<i64: 8, 128>}, {transform_indices = @transform_2, window_bounds = array<i64: 2, 8, 128>}]} {
    %c0 = arith.constant 0 : index
    %c0_0 = arith.constant 0 : index
    %c0_1 = arith.constant 0 : index
    %0 = vector.load %arg2[%c0, %c0_0, %c0_1] : memref<2x8x128xf32, #tpu.memory_space<vmem>>, vector<2x8x128xf32>
    %c0_2 = arith.constant 0 : index
    %c0_3 = arith.constant 0 : index
    %1 = vector.load %arg3[%c0_2, %c0_3] : memref<8x128xf32, #tpu.memory_space<vmem>>, vector<8x128xf32>
    %2 = vector.shape_cast %1 : vector<8x128xf32> to vector<1x8x128xf32>
    %3 = vector.broadcast %2 : vector<1x8x128xf32> to vector<2x8x128xf32>
    %4 = arith.addf %0, %3 : vector<2x8x128xf32>
    %c0_4 = arith.constant 0 : index
    %c0_5 = arith.constant 0 : index
    %c0_6 = arith.constant 0 : index
    %5 = vector.load %arg4[%c0_4, %c0_5, %c0_6] : memref<2x8x128xf32, #tpu.memory_space<vmem>>, vector<2x8x128xf32>
    tpu.vector_store %arg4[%c0_4, %c0_5, %c0_6], %4 {strides = array<i32>} : memref<2x8x128xf32, #tpu.memory_space<vmem>>, vector<2x8x128xf32>,
    return
  }
  func.func @transform_0(%arg0: i32, %arg1: memref<1xi32, #tpu.memory_space<smem>>) -> (i32, i32, i32) {
    %c0_i32 = arith.constant 0 : i32
    %c0_i32_0 = arith.constant 0 : i32
    %c0_i32_1 = arith.constant 0 : i32
    return %c0_i32, %arg0, %c0_i32_0 : i32, i32, i32
  }
  func.func @transform_1(%arg0: i32, %arg1: memref<1xi32, #tpu.memory_space<smem>>) -> (i32, i32) {
    %c0_i32 = arith.constant 0 : i32
    %c0_i32_0 = arith.constant 0 : i32
    return %arg0, %c0_i32 : i32, i32
  }
  func.func @transform_2(%arg0: i32, %arg1: memref<1xi32, #tpu.memory_space<smem>>) -> (i32, i32, i32) {
    %c0_i32 = arith.constant 0 : i32
    %c0_i32_0 = arith.constant 0 : i32
    %c0_i32_1 = arith.constant 0 : i32
    return %c0_i32, %arg0, %c0_i32_0 : i32, i32, i32
  }
}

</mosaic_0001>

<bundles_post_ra>
// kernel: tpu_custom_call.1
= control target key start
LH: loop header
LB: loop body
LE: loop exit
PB: predicated region body
PF: predicated region fallthrough
CT: control target
= control target key end

     0   :  { %9 = vsyncpa [#allocation5], 0  ;;  %s188_s0 = inlined_call_operand.<no memory space> [shape: s32[1], index: 0, kind: input, shape index: {}]   ;;  %s189_s1 = inlined_call_operand.hbm [shape: f32[2,8,128], index: 1, kind: input, shape index: {}]   ;;  %s190_s2 = inlined_call_operand.hbm [shape: f32[8,128], index: 2, kind: input, shape index: {}]   ;;  %s191_s3 = inlined_call_operand.hbm [shape: f32[2,8,128], index: 3, kind: output, shape index: {}]  }
   0x1   :  { %10 = vsyncpa [#allocation8], 0 }
   0x2   :  { %11 = vsyncpa [#allocation6], 0  ;;  %s16_s14 = sshll.u32 %s189_s1, 4  ;;  %s154_s15 = smov [#allocation4]   ;;  %s17_s14 = int_to_ptr.hbm [resolvable:$true] %s16_s14 }
   0x3   :  { %s18_s16 = sshll.u32 %s154_s15, 4  ;;  %s30_s18 = sshll.u32 %s190_s2, 4  ;;  %s19_s16 = int_to_ptr.vmem [resolvable:$true] %s18_s16  ;;  %s31_s18 = int_to_ptr.hbm [resolvable:$true] %s30_s18 }
   0x4   :  { %s155_s19 = smov 128   ;;  %s156_s20 = smov 8  }
   0x5   :  { %24 = dma.hbm_to_vmem [thread:$0]  %s17_s14, 256, %s19_s16, [#allocation5], %s155_s19, %s155_s19, %s156_s20  }
   0x6   :  { %s157_s21 = smov [#allocation7]  }
   0x7   :  { %s32_s22 = sshll.u32 %s157_s21, 4  ;;  %s33_s22 = int_to_ptr.vmem [resolvable:$true] %s32_s22 }
   0x8   :  { %35 = dma.hbm_to_vmem [thread:$0]  %s31_s18, 128, %s33_s22, [#allocation8]  }
   0x9   :  { %148 = dma.done.wait [#allocation5], 256  }
   0xa   :  { %149 = vsyncadd [#allocation5], 4294967040 }
   0xb   :  { %150 = dma.done.wait [#allocation8], 128  }
   0xc   :  { %151 = vsyncadd [#allocation8], 4294967168  ;;  %s158_s1 = smov [#allocation9]   ;;  %s57_s26 = sshll.u32 %s191_s3, 4  ;;  %v44_v0 = vld [vmem:[#allocation4] sm:$0xff]  ;;  %v46_v1 = vld [vmem:[#allocation7] sm:$0xff]  ;;  %s58_s26 = int_to_ptr.hbm [resolvable:$true] %s57_s26 }
   0xd   :  { %s55_s23 = sshll.u32 %s158_s1, 4  ;;  %v45_v2 = vld [vmem:[#allocation4 + $0x8] sm:$0xff]  ;;  %v47_v3 = vadd.f32 %v46_v1, %v44_v0  ;;  %s56_s23 = int_to_ptr.vmem [resolvable:$true] %s55_s23 }
   0xe   :  { %v48_v4 = vadd.f32 %v46_v1, %v45_v2 }
   0xf   :  { %49 = vst [vmem:[#allocation9] sm:$0xff] %v47_v3 }
  0x10   :  { %50 = vst [vmem:[#allocation9 + $0x8] sm:$0xff] %v48_v4 }
  0x11   :  { %63 = dma.vmem_to_hbm [thread:$0]  %s56_s23, 256, %s58_s26, [#allocation6], %s155_s19, %s155_s19, %s156_s20  }
  0x12   :  { %152 = dma.done.wait [#allocation6], 256  }
  0x13   :  { %153 = vsyncadd [#allocation6], 4294967040 }
  0x14   :  { %68 = vsyncpa [#allocation5], 1 }
  0x15   :  { %69 = vsyncpa [#allocation8], 1 }
  0x16   :  { %70 = vsyncpa [#allocation6], 1 }

</bundles_post_ra>
